<compile_context>
chip_gen: v6e
topology: v6e:2x2x1
jax: 0.10.0
libtpu: 0.0.40
codegen_flags: <defaults>
</compile_context>

<pallas_src>
import functools
from typing import NamedTuple, Optional

import jax
import jax.numpy as jnp
from jax import lax
from jax.experimental import pallas as pl
from jax.experimental.pallas import tpu as pltpu


def _round_up(n, m):
    return ((n + m - 1) // m) * m


def _lane_alignment(n_features):
    """Lane alignment for the feature axis.

    v6e / v7x MXUs are 2x256x256, so large feature counts want 256-aligned
    K/N to fill the systolic array.  v5e's 128-wide MXU prefers 128 (less
    padded work).  Only queried for large F; small F always uses 128.
    """
    if n_features <= 256:
        return 128
    try:  # best effort; never triggered at small shapes
        if "v5" in str(pltpu.get_tpu_info()).lower():
            return 128
    except Exception:
        pass
    return 256


def _choose_tile_m(B, F_pad):
    """Batch-tile rows (TM)."""
    if B <= 128:
        return _round_up(B, 8)
    # Large batches: 256-512 row tiles amortize the ~0.35us per-grid-step
    # overhead.  Keep double-buffered X+out tiles under ~16 MiB and keep at
    # least 2 grid steps so both v7x TensorCores get work.
    for tm in (512, 256, 128):
        if B >= 2 * tm and 4 * tm * F_pad * 4 <= (16 << 20):
            return tm
    return 128


# ----------------------------------------------------------------------------
# Kernels: whole iterative hot path (matmul [+bias via augmented lane] + act,
# repeated num_iterations times) for one batch tile.
# ----------------------------------------------------------------------------
def _iter_kernel_relu(x_ref, w_ref, o_ref, *, num_iterations, unroll):
    w = w_ref[...]                                       # (F_pad, F_pad) bf16, resident

    def body(_, x):
        # bf16 operands into the MXU, f32 accumulate; bias comes in through
        # the augmented 1.0 lane of x / the corresponding row of w.
        y = jnp.dot(x.astype(jnp.bfloat16), w, preferred_element_type=jnp.float32)
        return jnp.maximum(y, 0.0)

    o_ref[...] = lax.fori_loop(0, num_iterations, body, x_ref[...], unroll=unroll)


def _iter_kernel_masked(x_ref, w_ref, m_ref, o_ref, *, num_iterations, unroll):
    w = w_ref[...]
    # Hoisted out of the loop: JAX does not CSE broadcast_in_dim.
    relu = jnp.broadcast_to(m_ref[...] > 0.0, o_ref.shape)

    def body(_, x):
        y = jnp.dot(x.astype(jnp.bfloat16), w, preferred_element_type=jnp.float32)
        return jnp.where(relu, jnp.maximum(y, 0.0), y)

    o_ref[...] = lax.fori_loop(0, num_iterations, body, x_ref[...], unroll=unroll)


# ----------------------------------------------------------------------------
# One-time parameter preparation (hoisted out of the per-call forward path).
# ----------------------------------------------------------------------------
class FoldedParams(NamedTuple):
    w_aug: jax.Array              # (F_pad, F_pad) bf16; bias folded into lane F
    mask: Optional[jax.Array]     # (1, F_pad) f32, or None when all-ReLU
    F: int                        # sum(sizes)
    F_pad: int
    bias_lane: int


def prepare_params(W_big, b_big, act_mask=None):
    """Pad / cast the folded block matrix once and fold the bias into it.

    W_big: (F, F) = (out_features, in_features); b_big: (F,);
    act_mask: (F,) with >0 -> ReLU, 0 -> identity (None => all ReLU).
    """
    F = W_big.shape[0]
    lane = _lane_alignment(F + 1)
    F_pad = _round_up(F + 1, lane)        # +1 reserves the augmented bias lane
    bias_lane = F

    # Kernel computes y = x @ w_aug with w_aug[k, j] = W_big[j, k]; the bias
    # row (lane F) holds b, and w_aug[F, F] = 1 keeps the 1.0 lane alive
    # across iterations (ReLU/identity both preserve 1.0).
    w_aug = jnp.zeros((F_pad, F_pad), jnp.bfloat16)
    w_aug = w_aug.at[:F, :F].set(W_big.T.astype(jnp.bfloat16))
    w_aug = w_aug.at[bias_lane, :F].set(b_big.astype(jnp.bfloat16))
    w_aug = w_aug.at[bias_lane, bias_lane].set(1.0)

    all_relu = act_mask is None or bool(jnp.all(act_mask > 0.0))
    if all_relu:
        mask = None
    else:
        mask = jnp.zeros((1, F_pad), jnp.float32).at[0, :F].set(
            act_mask.astype(jnp.float32))

    return FoldedParams(w_aug, mask, F, F_pad, bias_lane)


# ----------------------------------------------------------------------------
# Forward wrapper.
# ----------------------------------------------------------------------------
def flat_iterative_sequential2d(x, params: FoldedParams, num_iterations: int):
    """x: (B, <=F) f32 flattened features; returns (B, F) f32."""
    F, F_pad, bias_lane = params.F, params.F_pad, params.bias_lane
    B = x.shape[0]

    TM = _choose_tile_m(B, F_pad)
    B_pad = _round_up(B, TM)
    grid = (B_pad // TM,)

    # Zero-pad (missing input blocks are None -> zeros) + augmented 1.0 bias
    # lane for valid rows.  Padded rows keep a 0 bias lane -> stay exactly 0.
    x_p = jnp.zeros((B_pad, F_pad), jnp.float32)
    x_p = x_p.at[:B, : x.shape[1]].set(x.astype(jnp.float32))
    x_p = x_p.at[:B, bias_lane].set(1.0)

    # Serially dependent iterations: unrolling only hides loop overhead, so
    # keep it small for big tiles (vreg pressure), larger for tiny tiles.
    if num_iterations <= 0:
        unroll = 1
    elif TM * F_pad <= 128 * 256:
        unroll = min(num_iterations, 8)
    else:
        unroll = min(num_iterations, 2)

    # Grid-invariant operands are single-buffered (no pointless double buffer).
    w_spec = pl.BlockSpec((F_pad, F_pad), lambda i: (0, 0),
                          pipeline_mode=pl.Buffered(1))
    x_spec = pl.BlockSpec((TM, F_pad), lambda i: (i, 0))
    o_spec = pl.BlockSpec((TM, F_pad), lambda i: (i, 0))

    if params.mask is None:
        kernel = functools.partial(_iter_kernel_relu,
                                   num_iterations=num_iterations, unroll=unroll)
        in_specs = [x_spec, w_spec]
        operands = (x_p, params.w_aug)
    else:
        kernel = functools.partial(_iter_kernel_masked,
                                   num_iterations=num_iterations, unroll=unroll)
        m_spec = pl.BlockSpec((1, F_pad), lambda i: (0, 0),
                              pipeline_mode=pl.Buffered(1))
        in_specs = [x_spec, w_spec, m_spec]
        operands = (x_p, params.w_aug, params.mask)

    # Explicit VMEM budget: resident bf16 W (single buffer) + double-buffered
    # X / out tiles + mask + slack (default scoped limit is only 16 MiB on
    # v5e / 32 MiB on v6e+v7x).
    w_bytes = F_pad * F_pad * 2
    tile_bytes = TM * F_pad * 4
    needed = w_bytes + 4 * tile_bytes + 4 * F_pad * 4 + (2 << 20)
    vmem_limit = max(min(needed, 128 << 20), 16 << 20)

    cost = pl.CostEstimate(
        flops=2 * max(num_iterations, 1) * B_pad * F_pad * F_pad,
        transcendentals=0,
        bytes_accessed=2 * B_pad * F_pad * 4 + w_bytes + F_pad * 4,
    )

    out = pl.pallas_call(
        kernel,
        out_shape=jax.ShapeDtypeStruct((B_pad, F_pad), jnp.float32),
        grid=grid,
        in_specs=in_specs,
        out_specs=o_spec,
        compiler_params=pltpu.CompilerParams(
            dimension_semantics=("parallel",),   # batch tiles are independent
            vmem_limit_bytes=int(vmem_limit),
        ),
        cost_estimate=cost,
    )(*operands)

    return out[:B, :F]


# ----------------------------------------------------------------------------
# Deterministic parameter construction (synthetic "blocks" grid) + reference.
# ----------------------------------------------------------------------------
def build_params(sizes, key):
    """Fold a blocks[i][j] grid (Linear(sizes[i], sizes[j]) or None) into one
    dense (F, F) weight (out_features, in_features), summed bias (F,), and a
    per-feature activation mask (all-ReLU default)."""
    n = len(sizes)
    F = sum(sizes)
    offs = [sum(sizes[:k]) for k in range(n + 1)]

    W_big = jnp.zeros((F, F), jnp.float32)
    b_big = jnp.zeros((F,), jnp.float32)

    keys = jax.random.split(key, n * n * 2)
    kidx = 0
    for i in range(n):            # input block index
        for j in range(n):        # output block index
            present = ((i + j) % 2 == 0) or (i == j)   # some blocks are None
            kw, kb = keys[kidx], keys[kidx + 1]
            kidx += 2
            if not present:
                continue
            fan_in = sizes[i]
            bound = 1.0 / (fan_in ** 0.5)
            Wij = jax.random.uniform(kw, (sizes[j], sizes[i]), jnp.float32, -bound, bound)
            bij = jax.random.uniform(kb, (sizes[j],), jnp.float32, -bound, bound)
            W_big = W_big.at[offs[j]:offs[j + 1], offs[i]:offs[i + 1]].set(Wij)
            b_big = b_big.at[offs[j]:offs[j + 1]].add(bij)

    act_mask = jnp.ones((F,), jnp.float32)   # default: F.relu on every segment
    return W_big, b_big, act_mask


def reference_forward(x, W_big, b_big, act_mask, num_iterations):
    """Pure-JAX reference matching the kernel's arithmetic (bf16 MXU operands,
    f32 accumulate, bias quantized to bf16 because it rides the MXU).
    NOTE: this (intentionally) mirrors the kernel's bf16 matmul; a strict-f32
    PyTorch module would differ at the bf16 rounding level."""
    F = W_big.shape[1]
    if x.shape[1] < F:
        x = jnp.pad(x, ((0, 0), (0, F - x.shape[1])))
    w_bf16 = W_big.T.astype(jnp.bfloat16)
    b_q = b_big.astype(jnp.bfloat16).astype(jnp.float32)
    for _ in range(num_iterations):
        y = jnp.dot(x.astype(jnp.bfloat16), w_bf16,
                    preferred_element_type=jnp.float32) + b_q
        x = jnp.where(act_mask > 0.0, jnp.maximum(y, 0.0), y)
    return x


# ----------------------------------------------------------------------------
if __name__ == "__main__":
    sizes = [32, 16, 16]          # feature-segment sizes; F = 64
    num_iterations = 3
    batch = 2
    F_total = sum(sizes)

    key = jax.random.PRNGKey(0)
    k_param, k_x = jax.random.split(key)

    W_big, b_big, act_mask = build_params(sizes, k_param)
    params = prepare_params(W_big, b_big, act_mask)   # one-time pad + bf16 cast
    x = jax.random.normal(k_x, (batch, F_total), dtype=jnp.float32)

    out = flat_iterative_sequential2d(x, params, num_iterations)
    out = jax.block_until_ready(out)

    ref = reference_forward(x, W_big, b_big, act_mask, num_iterations)
    assert out.shape == (batch, F_total)
    assert jnp.allclose(out, ref, atol=1e-3, rtol=1e-3), "Pallas kernel mismatch vs reference"

    print("KERNEL_OK")
</pallas_src>

<mosaic_0001>
module attributes {stable_mosaic.version = 11 : i64} {
  func.func @_iter_kernel_relu(%arg0: i32, %arg1: memref<8x128xf32, #tpu.memory_space<vmem>>, %arg2: memref<128x128xbf16, #tpu.memory_space<vmem>>, %arg3: memref<8x128xf32, #tpu.memory_space<vmem>>) attributes {dimension_semantics = [#tpu.dimension_semantics<parallel>], iteration_bounds = array<i64: 1>, scalar_prefetch = 0 : i64, scratch_operands = 0 : i64, tpu.core_type = #tpu.core_type<tc>, window_params = [{transform_indices = @transform_0, window_bounds = array<i64: 8, 128>}, {pipeline_mode = #tpu.pipeline_mode<synchronous>, transform_indices = @transform_1, window_bounds = array<i64: 128, 128>}, {transform_indices = @transform_2, window_bounds = array<i64: 8, 128>}]} {
    %c0 = arith.constant 0 : index
    %c0_0 = arith.constant 0 : index
    %0 = vector.load %arg2[%c0, %c0_0] : memref<128x128xbf16, #tpu.memory_space<vmem>>, vector<128x128xbf16>
    %c0_1 = arith.constant 0 : index
    %c0_2 = arith.constant 0 : index
    %1 = vector.load %arg1[%c0_1, %c0_2] : memref<8x128xf32, #tpu.memory_space<vmem>>, vector<8x128xf32>
    %c0_i32 = arith.constant 0 : i32
    %2 = arith.truncf %1 : vector<8x128xf32> to vector<8x128xbf16>
    %cst = arith.constant dense<0.000000e+00> : vector<8x128xf32>
    %3 = tpu.matmul %2, %0, %cst {dimension_numbers = #tpu.dot_dimension_numbers<[1], [0], [0], [1], [0, 0, 1, 1], [], []>} : vector<8x128xbf16>, vector<128x128xbf16>, vector<8x128xf32> -> vector<8x128xf32>
    %cst_3 = arith.constant 0.000000e+00 : f32
    %4 = vector.broadcast %cst_3 : f32 to vector<8x128xf32>
    %5 = arith.maximumf %3, %4 : vector<8x128xf32>
    %c1_i32 = arith.constant 1 : i32
    %6 = arith.truncf %5 : vector<8x128xf32> to vector<8x128xbf16>
    %cst_4 = arith.constant dense<0.000000e+00> : vector<8x128xf32>
    %7 = tpu.matmul %6, %0, %cst_4 {dimension_numbers = #tpu.dot_dimension_numbers<[1], [0], [0], [1], [0, 0, 1, 1], [], []>} : vector<8x128xbf16>, vector<128x128xbf16>, vector<8x128xf32> -> vector<8x128xf32>
    %cst_5 = arith.constant 0.000000e+00 : f32
    %8 = vector.broadcast %cst_5 : f32 to vector<8x128xf32>
    %9 = arith.maximumf %7, %8 : vector<8x128xf32>
    %c2_i32 = arith.constant 2 : i32
    %10 = arith.truncf %9 : vector<8x128xf32> to vector<8x128xbf16>
    %cst_6 = arith.constant dense<0.000000e+00> : vector<8x128xf32>
    %11 = tpu.matmul %10, %0, %cst_6 {dimension_numbers = #tpu.dot_dimension_numbers<[1], [0], [0], [1], [0, 0, 1, 1], [], []>} : vector<8x128xbf16>, vector<128x128xbf16>, vector<8x128xf32> -> vector<8x128xf32>
    %cst_7 = arith.constant 0.000000e+00 : f32
    %12 = vector.broadcast %cst_7 : f32 to vector<8x128xf32>
    %13 = arith.maximumf %11, %12 : vector<8x128xf32>
    %c0_8 = arith.constant 0 : index
    %c0_9 = arith.constant 0 : index
    %14 = vector.load %arg3[%c0_8, %c0_9] : memref<8x128xf32, #tpu.memory_space<vmem>>, vector<8x128xf32>
    tpu.vector_store %arg3[%c0_8, %c0_9], %13 {strides = array<i32>} : memref<8x128xf32, #tpu.memory_space<vmem>>, vector<8x128xf32>,
    return
  }
  func.func @transform_0(%arg0: i32) -> (i32, i32) {
    %c0_i32 = arith.constant 0 : i32
    %c0_i32_0 = arith.constant 0 : i32
    return %arg0, %c0_i32 : i32, i32
  }
  func.func @transform_1(%arg0: i32) -> (i32, i32) {
    %c0_i32 = arith.constant 0 : i32
    %c0_i32_0 = arith.constant 0 : i32
    %c0_i32_1 = arith.constant 0 : i32
    return %c0_i32, %c0_i32_0 : i32, i32
  }
  func.func @transform_2(%arg0: i32) -> (i32, i32) {
    %c0_i32 = arith.constant 0 : i32
    %c0_i32_0 = arith.constant 0 : i32
    return %arg0, %c0_i32 : i32, i32
  }
}

</mosaic_0001>

<bundles_post_ra>
// kernel: tpu_custom_call.1
= control target key start
LH: loop header
LB: loop body
LE: loop exit
PB: predicated region body
PF: predicated region fallthrough
CT: control target
= control target key end

     0   :  { %7 = vsyncpa [#allocation3], 0  ;;  %s457_s0 = inlined_call_operand.hbm [shape: f32[8,128], index: 0, kind: input, shape index: {}]   ;;  %s458_s1 = inlined_call_operand.hbm [shape: bf16[128,128], index: 1, kind: input, shape index: {}]   ;;  %s459_s2 = inlined_call_operand.hbm [shape: f32[8,128], index: 2, kind: output, shape index: {}]  }
   0x1   :  { %8 = vsyncpa [#allocation6], 0 }
   0x2   :  { %9 = vsyncpa [#allocation4], 0  ;;  %s423_s9 = smov [#allocation2]   ;;  %s424_s11 = smov [#allocation5]  }
   0x3   :  { %s16_s10 = sshll.u32 %s423_s9, 4  ;;  %s25_s12 = sshll.u32 %s424_s11, 4  ;;  %s17_s10 = int_to_ptr.vmem [resolvable:$true] %s16_s10  ;;  %s26_s12 = int_to_ptr.vmem [resolvable:$true] %s25_s12 }
   0x4   :  { %s365_s13 = scalar_lea.vmem %s17_s10, 128  ;;  %p370_p1 = scmp.lt.s32.totalorder %s17_s10, %s17_s10 }
   0x5   :  { %p366_p0 = scmp.ne.s32.totalorder %s17_s10, %s365_s13  ;;  %p371_p2 = scmp.lt.s32.totalorder %s365_s13, %s365_s13 }
   0x7   :  { %p372_p3 = por %p371_p2, %p370_p1 }
   0x9   :  { %p373_p4 = pnand %p372_p3, %p366_p0 }
   0xb   :  { %376 = shalt.err (!%p373_p4)
}
   0xc   :  { %19 = dma.hbm_to_vmem [thread:$0]  %s457_s0, 128, %s17_s10, [#allocation3]  }
   0xd   :  { %s385_s16 = scalar_lea.vmem %s26_s12, 1024  ;;  %p390_p6 = scmp.lt.s32.totalorder %s26_s12, %s26_s12 }
   0xe   :  { %p386_p5 = scmp.ne.s32.totalorder %s26_s12, %s385_s16  ;;  %p391_p7 = scmp.lt.s32.totalorder %s385_s16, %s385_s16 }
  0x10   :  { %p392_p8 = por %p391_p7, %p390_p6 }
  0x12   :  { %p393_p9 = pnand %p392_p8, %p386_p5 }
  0x14   :  { %396 = shalt.err (!%p393_p9)
}
  0x15   :  { %s425_s17 = smov 64   ;;  %s426_s18 = smov 4  }
  0x16   :  { %31 = dma.hbm_to_vmem [thread:$0]  %s458_s1, 1024, %s26_s12, [#allocation6], %s425_s17, %s425_s17, %s426_s18  }
  0x17   :  { %417 = dma.done.wait [#allocation3], 128  }
  0x18   :  { %418 = vsyncadd [#allocation3], 4294967168 }
  0x19   :  { %419 = dma.done.wait [#allocation6], 1024  }
  0x1a   :  { %420 = vsyncadd [#allocation6], 4294966272  ;;  %v427_v0 = vmov 0.0   ;;  %vm428_vm0 = vmmov 0   ;;  %v349_v1 = vld [vmem:[#allocation5 + $0x38] sm:$0xff]   ;;  %v350_v2 = vld [vmem:[#allocation5 + $0x30] sm:$0xff]  }
  0x1b   :  { %282 = vmatprep.subr.bf16.mxu0 %v427_v0  ;;  %298 = vmatprep.mubr.msk.bf16.mxu0 %vm428_vm0, %v427_v0  ;;  %v351_v3 = vld [vmem:[#allocation5 + $0x28] sm:$0xff]   ;;  %v352_v4 = vld [vmem:[#allocation5 + $0x20] sm:$0xff]   ;;  %v353_v5 = vld [vmem:[#allocation5 + $0x18] sm:$0xff]   ;;  %s429_s0 = smov [#allocation7]  }
  0x1c   :  { %302 = vmatprep.subr.bf16.mxu1 %v427_v0  ;;  %318 = vmatprep.mubr.msk.bf16.mxu1 %vm428_vm0, %v427_v0  ;;  %v354_v6 = vld [vmem:[#allocation5 + $0x10] sm:$0xff]   ;;  %v355_v7 = vld [vmem:[#allocation5 + $0x8] sm:$0xff]   ;;  %v356_v8 = vld [vmem:[#allocation5] sm:$0xff]   ;;  %s237_s1 = sshll.u32 %s429_s0, 4  ;;  %s238_s1 = int_to_ptr.vmem [resolvable:$true] %s237_s1 }
  0x1d   :  { %283 = vmatpush3.bf16.msra.mxu0 %v349_v1  ;;  %303 = vmatpush3.bf16.msra.mxu1 %v349_v1  ;;  %v55_v9 = vld [vmem:[#allocation2] sm:$0xff]  ;;  %s397_s21 = scalar_lea.vmem %s238_s1, 128  ;;  %p402_p11 = scmp.lt.s32.totalorder %s238_s1, %s238_s1 }
  0x1e   :  { %284 = vmatprep.subr.bf16.mxu0 %v427_v0  ;;  %304 = vmatprep.subr.bf16.mxu1 %v427_v0  ;;  %v56_v10 = vpack.c.bf16 %v55_v9, %v55_v9  ;;  %p398_p10 = scmp.ne.s32.totalorder %s238_s1, %s397_s21  ;;  %p403_p12 = scmp.lt.s32.totalorder %s397_s21, %s397_s21 }
  0x20   :  { %p404_p13 = por %p403_p12, %p402_p11 }
  0x21   :  { %285 = vmatpush3.bf16.msra.mxu0 %v350_v2  ;;  %305 = vmatpush3.bf16.msra.mxu1 %v350_v2 }
  0x22   :  { %286 = vmatprep.subr.bf16.mxu0 %v427_v0  ;;  %306 = vmatprep.subr.bf16.mxu1 %v427_v0  ;;  %p405_p0 = pnand %p404_p13, %p398_p10 }
  0x25   :  { %287 = vmatpush3.bf16.msra.mxu0 %v351_v3  ;;  %307 = vmatpush3.bf16.msra.mxu1 %v351_v3 }
  0x26   :  { %288 = vmatprep.subr.bf16.mxu0 %v427_v0  ;;  %308 = vmatprep.subr.bf16.mxu1 %v427_v0 }
  0x29   :  { %289 = vmatpush3.bf16.msra.mxu0 %v352_v4  ;;  %309 = vmatpush3.bf16.msra.mxu1 %v352_v4 }
  0x2a   :  { %290 = vmatprep.subr.bf16.mxu0 %v427_v0  ;;  %310 = vmatprep.subr.bf16.mxu1 %v427_v0 }
  0x2d   :  { %291 = vmatpush3.bf16.msra.mxu0 %v353_v5  ;;  %311 = vmatpush3.bf16.msra.mxu1 %v353_v5 }
  0x2e   :  { %292 = vmatprep.subr.bf16.mxu0 %v427_v0  ;;  %312 = vmatprep.subr.bf16.mxu1 %v427_v0 }
  0x31   :  { %293 = vmatpush3.bf16.msra.mxu0 %v354_v6  ;;  %313 = vmatpush3.bf16.msra.mxu1 %v354_v6 }
  0x32   :  { %294 = vmatprep.subr.bf16.mxu0 %v427_v0  ;;  %314 = vmatprep.subr.bf16.mxu1 %v427_v0 }
  0x35   :  { %295 = vmatpush3.bf16.msra.mxu0 %v355_v7  ;;  %315 = vmatpush3.bf16.msra.mxu1 %v355_v7 }
  0x36   :  { %296 = vmatprep.subr.bf16.mxu0 %v427_v0  ;;  %316 = vmatprep.subr.bf16.mxu1 %v427_v0 }
  0x39   :  { %297 = vmatpush3.bf16.msra.mxu0 %v356_v8  ;;  %317 = vmatpush3.bf16.msra.mxu1 %v356_v8 }
  0x3a   :  { %322 = vmatprep.subr.bf16.mxu0 %v427_v0 }
  0x3c   :  { %299 = vmatmul.mubr.bf16.vlgmr.msra.gmra.mxu0 %v56_v10 }
  0x3d   :  { %323 = vmatpush3.bf16.msra.mxu0 %v349_v1  ;;  %338 = vmatprep.mubr.msk.bf16.mxu0 %vm428_vm0, %v427_v0 }
  0x3e   :  { %324 = vmatprep.subr.bf16.mxu0 %v427_v0 }
  0x41   :  { %325 = vmatpush3.bf16.msra.mxu0 %v350_v2 }
  0x42   :  { %326 = vmatprep.subr.bf16.mxu0 %v427_v0 }
  0x45   :  { %327 = vmatpush3.bf16.msra.mxu0 %v351_v3 }
  0x46   :  { %328 = vmatprep.subr.bf16.mxu0 %v427_v0 }
  0x49   :  { %329 = vmatpush3.bf16.msra.mxu0 %v352_v4 }
  0x4a   :  { %330 = vmatprep.subr.bf16.mxu0 %v427_v0 }
  0x4d   :  { %331 = vmatpush3.bf16.msra.mxu0 %v353_v5 }
  0x4e   :  { %332 = vmatprep.subr.bf16.mxu0 %v427_v0 }
  0x51   :  { %333 = vmatpush3.bf16.msra.mxu0 %v354_v6 }
  0x52   :  { %334 = vmatprep.subr.bf16.mxu0 %v427_v0 }
  0x55   :  { %335 = vmatpush3.bf16.msra.mxu0 %v355_v7 }
  0x56   :  { %336 = vmatprep.subr.bf16.mxu0 %v427_v0 }
  0x59   :  { %337 = vmatpush3.bf16.msra.mxu0 %v356_v8 }
  0xfc   :  { %v139_v11 = vpop.f32.mrf.mxu0 }
  0xfd   :  { %v145_v12 = vmax.f32 %v139_v11, 0.0 }
  0xfe   :  { %v300_v13 = vpop.f32.mrf.mxu0 }
  0xff   :  { %v146_v14 = vpack.c.bf16 %v145_v12, %v145_v12 }
 0x100   :  { %v142_v15 = vpop.f32.mrf.mxu0 }
 0x101   :  { %319 = vmatmul.mubr.bf16.vlgmr.msra.gmra.mxu1 %v146_v14 }
 0x102   :  { %v301_v16 = vpop.f32.mrf.mxu0 }
 0x1c1   :  { %v181_v17 = vpop.f32.mrf.mxu1 }
 0x1c2   :  { %v187_v18 = vmax.f32 %v181_v17, 0.0 }
 0x1c3   :  { %v320_v19 = vpop.f32.mrf.mxu1 }
 0x1c4   :  { %v188_v20 = vpack.c.bf16 %v187_v18, %v187_v18 }
 0x1c5   :  { %v184_v21 = vpop.f32.mrf.mxu1 }
 0x1c6   :  { %339 = vmatmul.mubr.bf16.vlgmr.msra.gmra.mxu0 %v188_v20 }
 0x1c7   :  { %v321_v22 = vpop.f32.mrf.mxu1 }
 0x286   :  { %v223_v23 = vpop.f32.mrf.mxu0 }
 0x287   :  { %v229_v24 = vmax.f32 %v223_v23, 0.0 }
 0x288   :  { %v340_v25 = vpop.f32.mrf.mxu0 }
 0x289   :  { %230 = vst [vmem:[#allocation7] sm:$0xff] %v229_v24 }
 0x28a   :  { %v226_v26 = vpop.f32.mrf.mxu0 }
 0x28b   :  { %408 = shalt.err (!%p405_p0)
}
 0x28c   :  { %240 = dma.vmem_to_hbm [thread:$0]  %s238_s1, 128, %s459_s2, [#allocation4]   ;;  %v341_v27 = vpop.f32.mrf.mxu0 }
 0x28d   :  { %421 = dma.done.wait [#allocation4], 128  }
 0x28e   :  { %422 = vsyncadd [#allocation4], 4294967168 }
 0x28f   :  { %244 = vsyncpa [#allocation3], 1 }
 0x290   :  { %245 = vsyncpa [#allocation6], 1 }
 0x291   :  { %246 = vsyncpa [#allocation4], 1 }

</bundles_post_ra>
